<compile_context>
chip_gen: v6e
topology: v6e:2x2x1
jax: 0.10.0
libtpu: 0.0.40
codegen_flags: <defaults>
</compile_context>

<pallas_src>
import functools

import numpy as np
import jax
import jax.numpy as jnp
from jax.experimental import pallas as pl
from jax.experimental.pallas import tpu as pltpu


# ----------------------------- image warp kernel -----------------------------
def _warp_kernel(oy_ref, ox_ref, fy_ref, fx_ref,   # scalar prefetch (SMEM), one entry per image
                 x_ref, dc_ref,                     # VMEM inputs
                 o_ref,                             # VMEM output
                 pad_ref,                           # VMEM scratch: (H + 2P, W) f32 zero-padded rows
                 *, C, H, W, P, Bt):
    i = pl.program_id(0)

    # Zero the top/bottom padding bands once per grid step (the middle H rows are overwritten
    # for every (image, channel) below; the bands are never written again).
    pad_ref[pl.ds(0, P), :] = jnp.zeros((P, W), jnp.float32)
    pad_ref[pl.ds(P + H, P), :] = jnp.zeros((P, W), jnp.float32)

    dc = dc_ref[...]                                # (W, W) int32, grid-step invariant (resident)

    for ib in range(Bt):                            # static unroll; Bt kept small
        g = i * Bt + ib
        oy = oy_ref[g]
        ox = ox_ref[g]
        fy = fy_ref[g]
        fx = fx_ref[g]

        # Column interpolation matrix Bm[l, j]: (1-fx) where l-j == ox, fx where l-j == ox+1,
        # 0 elsewhere.  Out-of-range source columns match no row -> zero padding.
        Bm = jnp.where(dc == ox, 1.0 - fx,
                       jnp.where(dc == ox + 1, fx, 0.0)).astype(jnp.bfloat16)

        row0 = P + oy                               # clamped wrapper-side to [0, 2P-1]

        for c in range(C):
            # Copy the channel into the zero-padded scratch, then pick source rows i+oy and
            # i+oy+1 with dynamic sublane slices and blend -> exact f32 row pass.
            pad_ref[pl.ds(P, H), :] = x_ref[ib, c].astype(jnp.float32)
            r0 = pad_ref[pl.ds(row0, H), :]
            r1 = pad_ref[pl.ds(row0 + 1, H), :]
            rowmix = (1.0 - fy) * r0 + fy * r1      # (H, W) f32

            out_c = jnp.dot(rowmix.astype(jnp.bfloat16), Bm,
                            preferred_element_type=jnp.float32)
            o_ref[ib, c] = out_c.astype(o_ref.dtype)


# ----------------------------- wrapper -----------------------------
def _pick_images_per_block(batch, per_image_bytes, target_bytes=1 << 20, max_bt=8):
    bt = max(1, min(batch, max_bt, target_bytes // max(per_image_bytes, 1)))
    if batch >= 2:
        bt = min(bt, batch // 2)      # keep the grid >= 2 so both v7x TensorCores get work
    bt = max(bt, 1)
    while batch % bt:                 # Bt must divide B
        bt -= 1
    return bt


def data_augmentation_translate(x, y, key, translation_factor):
    """x: (B, C, H, W) float image, y: (B, N, 4) float xyxy boxes."""
    B, C, H, W = x.shape
    tf = float(translation_factor)

    # TODO(synk): kornia's internal torch RNG stream is not reproduced bit-exactly; we sample
    # the same U(-tf*dim, tf*dim) distribution deterministically with jax.random.
    kx, ky = jax.random.split(key)
    tx = jax.random.uniform(kx, (B,), jnp.float32, -tf * W, tf * W)
    ty = jax.random.uniform(ky, (B,), jnp.float32, -tf * H, tf * H)

    # Inverse-warp source coordinate: src = dst - t  ->  integer + fractional parts of (-t).
    oy_f = jnp.floor(-ty)
    ox_f = jnp.floor(-tx)
    fy = ((-ty) - oy_f).astype(jnp.float32)
    fx = ((-tx) - ox_f).astype(jnp.float32)

    # Row padding depth: enough so the dynamic source-row slice never leaves the scratch;
    # rounded to a multiple of 8 so the static scratch stores stay sublane-aligned.
    P = int(np.ceil(tf * H)) + 1
    P = ((P + 7) // 8) * 8
    oy_i = jnp.clip(oy_f, -P, P - 1).astype(jnp.int32)   # mathematically a no-op; OOB guard
    ox_i = ox_f.astype(jnp.int32)

    # Grid-invariant column-difference matrix, hoisted out of the kernel body and kept
    # resident in VMEM via a constant index_map.
    dc = (jnp.arange(W, dtype=jnp.int32)[:, None]
          - jnp.arange(W, dtype=jnp.int32)[None, :])     # (W, W): dc[l, j] = l - j

    per_image = C * H * W * x.dtype.itemsize
    Bt = _pick_images_per_block(B, per_image)
    grid = (B // Bt,)

    # VMEM budget: double-buffered in/out blocks + resident dc + scratch + live values.
    blk = Bt * per_image
    need = (4 * blk + 2 * W * W * 4 + (H + 2 * P) * W * 4
            + C * H * W * 4 + 2 * W * W)
    vmem_limit = int(min(max(2 * need, 32 << 20), 48 << 20))

    x_out = pl.pallas_call(
        functools.partial(_warp_kernel, C=C, H=H, W=W, P=P, Bt=Bt),
        out_shape=jax.ShapeDtypeStruct((B, C, H, W), x.dtype),
        grid_spec=pltpu.PrefetchScalarGridSpec(
            num_scalar_prefetch=4,
            grid=grid,
            in_specs=[
                pl.BlockSpec((Bt, C, H, W), lambda i, *_: (i, 0, 0, 0)),
                pl.BlockSpec((W, W), lambda i, *_: (0, 0)),   # dc: resident across steps
            ],
            out_specs=pl.BlockSpec((Bt, C, H, W), lambda i, *_: (i, 0, 0, 0)),
            scratch_shapes=[pltpu.VMEM((H + 2 * P, W), jnp.float32)],
        ),
        compiler_params=pltpu.CompilerParams(
            dimension_semantics=("parallel",),   # shard the image grid across v7x's 2 TCs
            vmem_limit_bytes=vmem_limit,
        ),
    )(oy_i, ox_i, fy, fx, x, dc)

    # Bbox translation is a trivial broadcast add: keep it in XLA (fused for free).
    shift = jnp.stack([tx, ty, tx, ty], axis=1)[:, None, :]   # (B, 1, 4)
    y_out = y + shift

    return x_out, y_out, (tx, ty, oy_i, ox_i, fy, fx)


# ----------------------------- reference (numpy, float64) -----------------------------
def _ref_warp_single(img, oy, ox, fy, fx):
    H, W = img.shape
    ii = np.arange(H)[:, None]
    jj = np.arange(W)[None, :]

    def get(yy, xx):
        valid = (yy >= 0) & (yy < H) & (xx >= 0) & (xx < W)
        return np.where(valid, img[np.clip(yy, 0, H - 1), np.clip(xx, 0, W - 1)], 0.0)

    y0 = ii + oy
    x0 = jj + ox
    return ((1 - fy) * (1 - fx) * get(y0, x0)
            + (1 - fy) * fx * get(y0, x0 + 1)
            + fy * (1 - fx) * get(y0 + 1, x0)
            + fy * fx * get(y0 + 1, x0 + 1))


if __name__ == "__main__":
    B, C, H, W, N = 2, 4, 16, 16, 3
    translation_factor = 0.2

    key = jax.random.PRNGKey(0)
    kimg, kbox, kaug = jax.random.split(key, 3)
    x = jax.random.normal(kimg, (B, C, H, W), dtype=jnp.float32)
    # bboxes xyxy inside the image
    xy1 = jax.random.uniform(kbox, (B, N, 2), jnp.float32, 0.0, 8.0)
    wh = jax.random.uniform(jax.random.fold_in(kbox, 1), (B, N, 2), jnp.float32, 1.0, 7.0)
    y = jnp.concatenate([xy1, xy1 + wh], axis=-1)  # (B, N, 4)

    x_out, y_out, (tx, ty, oy_i, ox_i, fy, fx) = data_augmentation_translate(
        x, y, kaug, translation_factor)
    x_out = jax.block_until_ready(x_out)
    y_out = jax.block_until_ready(y_out)

    # numerical check vs float64 numpy reference
    x_np = np.asarray(x, dtype=np.float64)
    y_np = np.asarray(y, dtype=np.float64)
    oy_np = np.asarray(oy_i)
    ox_np = np.asarray(ox_i)
    fy_np = np.asarray(fy, dtype=np.float64)
    fx_np = np.asarray(fx, dtype=np.float64)
    tx_np = np.asarray(tx, dtype=np.float64)
    ty_np = np.asarray(ty, dtype=np.float64)

    ref_img = np.zeros((B, C, H, W), dtype=np.float64)
    for b in range(B):
        for c in range(C):
            ref_img[b, c] = _ref_warp_single(x_np[b, c], int(oy_np[b]), int(ox_np[b]),
                                             fy_np[b], fx_np[b])
    ref_box = y_np + np.stack([tx_np, ty_np, tx_np, ty_np], axis=1)[:, None, :]

    # Row pass is exact f32; column pass is a bf16-operand MXU matmul -> relaxed tolerance
    # (acceptable for a data-augmentation warp).
    np.testing.assert_allclose(np.asarray(x_out), ref_img, atol=5e-2, rtol=5e-2)
    np.testing.assert_allclose(np.asarray(y_out), ref_box, atol=1e-4, rtol=1e-4)
    print("KERNEL_OK")
</pallas_src>

<mosaic_0001>
module attributes {stable_mosaic.version = 11 : i64} {
  func.func @_warp_kernel(%arg0: i32, %arg1: memref<2xi32, #tpu.memory_space<smem>>, %arg2: memref<2xi32, #tpu.memory_space<smem>>, %arg3: memref<2xf32, #tpu.memory_space<smem>>, %arg4: memref<2xf32, #tpu.memory_space<smem>>, %arg5: memref<1x4x16x16xf32, #tpu.memory_space<vmem>>, %arg6: memref<16x16xi32, #tpu.memory_space<vmem>>, %arg7: memref<1x4x16x16xf32, #tpu.memory_space<vmem>>, %arg8: memref<32x16xf32, #tpu.memory_space<vmem>>) attributes {dimension_semantics = [#tpu.dimension_semantics<parallel>], iteration_bounds = array<i64: 2>, scalar_prefetch = 4 : i64, scratch_operands = 1 : i64, tpu.core_type = #tpu.core_type<tc>, window_params = [{transform_indices = @transform_0, window_bounds = array<i64: 1, 4, 16, 16>}, {pipeline_mode = #tpu.pipeline_mode<synchronous>, transform_indices = @transform_1, window_bounds = array<i64: 16, 16>}, {transform_indices = @transform_2, window_bounds = array<i64: 1, 4, 16, 16>}]} {
    %cst = arith.constant 0.000000e+00 : f32
    %0 = vector.broadcast %cst : f32 to vector<8x16xf32>
    %c0 = arith.constant 0 : index
    %c0_0 = arith.constant 0 : index
    %1 = vector.load %arg8[%c0, %c0_0] : memref<32x16xf32, #tpu.memory_space<vmem>>, vector<8x16xf32>
    tpu.vector_store %arg8[%c0, %c0_0], %0 {strides = array<i32>} : memref<32x16xf32, #tpu.memory_space<vmem>>, vector<8x16xf32>,
    %cst_1 = arith.constant 0.000000e+00 : f32
    %2 = vector.broadcast %cst_1 : f32 to vector<8x16xf32>
    %c24 = arith.constant 24 : index
    %c0_2 = arith.constant 0 : index
    %3 = vector.load %arg8[%c24, %c0_2] : memref<32x16xf32, #tpu.memory_space<vmem>>, vector<8x16xf32>
    tpu.vector_store %arg8[%c24, %c0_2], %2 {strides = array<i32>} : memref<32x16xf32, #tpu.memory_space<vmem>>, vector<8x16xf32>,
    %c0_3 = arith.constant 0 : index
    %c0_4 = arith.constant 0 : index
    %4 = vector.load %arg6[%c0_3, %c0_4] : memref<16x16xi32, #tpu.memory_space<vmem>>, vector<16x16xi32>
    %c1_i32 = arith.constant 1 : i32
    %5 = arith.muli %arg0, %c1_i32 : i32
    %c0_i32 = arith.constant 0 : i32
    %6 = arith.addi %5, %c0_i32 : i32
    %7 = arith.index_cast %6 : i32 to index
    %8 = memref.load %arg1[%7] : memref<2xi32, #tpu.memory_space<smem>>
    %9 = arith.index_cast %6 : i32 to index
    %10 = memref.load %arg2[%9] : memref<2xi32, #tpu.memory_space<smem>>
    %11 = arith.index_cast %6 : i32 to index
    %12 = memref.load %arg3[%11] : memref<2xf32, #tpu.memory_space<smem>>
    %13 = arith.index_cast %6 : i32 to index
    %14 = memref.load %arg4[%13] : memref<2xf32, #tpu.memory_space<smem>>
    %15 = vector.broadcast %10 : i32 to vector<16x16xi32>
    %16 = arith.cmpi eq, %4, %15 : vector<16x16xi32>
    %cst_5 = arith.constant 1.000000e+00 : f32
    %17 = arith.subf %cst_5, %14 : f32
    %c1_i32_6 = arith.constant 1 : i32
    %18 = arith.addi %10, %c1_i32_6 : i32
    %19 = vector.broadcast %18 : i32 to vector<16x16xi32>
    %20 = arith.cmpi eq, %4, %19 : vector<16x16xi32>
    %cst_7 = arith.constant 0.000000e+00 : f32
    %21 = vector.broadcast %14 : f32 to vector<16x16xf32>
    %22 = vector.broadcast %cst_7 : f32 to vector<16x16xf32>
    %23 = arith.select %20, %21, %22 : vector<16x16xi1>, vector<16x16xf32>
    %24 = vector.broadcast %17 : f32 to vector<16x16xf32>
    %25 = arith.select %16, %24, %23 : vector<16x16xi1>, vector<16x16xf32>
    %26 = arith.truncf %25 : vector<16x16xf32> to vector<16x16xbf16>
    %c8_i32 = arith.constant 8 : i32
    %27 = arith.addi %c8_i32, %8 : i32
    %c0_8 = arith.constant 0 : index
    %c0_9 = arith.constant 0 : index
    %c0_10 = arith.constant 0 : index
    %c0_11 = arith.constant 0 : index
    %28 = vector.load %arg5[%c0_8, %c0_9, %c0_10, %c0_11] : memref<1x4x16x16xf32, #tpu.memory_space<vmem>>, vector<1x1x16x16xf32>
    %29 = vector.shape_cast %28 : vector<1x1x16x16xf32> to vector<16x16xf32>
    %c8 = arith.constant 8 : index
    %c0_12 = arith.constant 0 : index
    %30 = vector.load %arg8[%c8, %c0_12] : memref<32x16xf32, #tpu.memory_space<vmem>>, vector<16x16xf32>
    tpu.vector_store %arg8[%c8, %c0_12], %29 {strides = array<i32>} : memref<32x16xf32, #tpu.memory_space<vmem>>, vector<16x16xf32>,
    %31 = arith.index_cast %27 : i32 to index
    %c0_13 = arith.constant 0 : index
    %32 = vector.load %arg8[%31, %c0_13] : memref<32x16xf32, #tpu.memory_space<vmem>>, vector<16x16xf32>
    %c1_i32_14 = arith.constant 1 : i32
    %33 = arith.addi %27, %c1_i32_14 : i32
    %34 = arith.index_cast %33 : i32 to index
    %c0_15 = arith.constant 0 : index
    %35 = vector.load %arg8[%34, %c0_15] : memref<32x16xf32, #tpu.memory_space<vmem>>, vector<16x16xf32>
    %cst_16 = arith.constant 1.000000e+00 : f32
    %36 = arith.subf %cst_16, %12 : f32
    %37 = vector.broadcast %36 : f32 to vector<16x16xf32>
    %38 = arith.mulf %37, %32 : vector<16x16xf32>
    %39 = vector.broadcast %12 : f32 to vector<16x16xf32>
    %40 = arith.mulf %39, %35 : vector<16x16xf32>
    %41 = arith.addf %38, %40 : vector<16x16xf32>
    %42 = arith.truncf %41 : vector<16x16xf32> to vector<16x16xbf16>
    %cst_17 = arith.constant dense<0.000000e+00> : vector<16x16xf32>
    %43 = tpu.matmul %42, %26, %cst_17 {dimension_numbers = #tpu.dot_dimension_numbers<[1], [0], [0], [1], [0, 0, 1, 1], [], []>} : vector<16x16xbf16>, vector<16x16xbf16>, vector<16x16xf32> -> vector<16x16xf32>
    %c0_18 = arith.constant 0 : index
    %c0_19 = arith.constant 0 : index
    %c0_20 = arith.constant 0 : index
    %c0_21 = arith.constant 0 : index
    %44 = vector.load %arg7[%c0_18, %c0_19, %c0_20, %c0_21] : memref<1x4x16x16xf32, #tpu.memory_space<vmem>>, vector<1x1x16x16xf32>
    %45 = vector.shape_cast %44 : vector<1x1x16x16xf32> to vector<16x16xf32>
    %46 = vector.shape_cast %43 : vector<16x16xf32> to vector<1x1x16x16xf32>
    tpu.vector_store %arg7[%c0_18, %c0_19, %c0_20, %c0_21], %46 {strides = array<i32>} : memref<1x4x16x16xf32, #tpu.memory_space<vmem>>, vector<1x1x16x16xf32>,
    %c0_22 = arith.constant 0 : index
    %c1 = arith.constant 1 : index
    %c0_23 = arith.constant 0 : index
    %c0_24 = arith.constant 0 : index
    %47 = vector.load %arg5[%c0_22, %c1, %c0_23, %c0_24] : memref<1x4x16x16xf32, #tpu.memory_space<vmem>>, vector<1x1x16x16xf32>
    %48 = vector.shape_cast %47 : vector<1x1x16x16xf32> to vector<16x16xf32>
    %c8_25 = arith.constant 8 : index
    %c0_26 = arith.constant 0 : index
    %49 = vector.load %arg8[%c8_25, %c0_26] : memref<32x16xf32, #tpu.memory_space<vmem>>, vector<16x16xf32>
    tpu.vector_store %arg8[%c8_25, %c0_26], %48 {strides = array<i32>} : memref<32x16xf32, #tpu.memory_space<vmem>>, vector<16x16xf32>,
    %50 = arith.index_cast %27 : i32 to index
    %c0_27 = arith.constant 0 : index
    %51 = vector.load %arg8[%50, %c0_27] : memref<32x16xf32, #tpu.memory_space<vmem>>, vector<16x16xf32>
    %c1_i32_28 = arith.constant 1 : i32
    %52 = arith.addi %27, %c1_i32_28 : i32
    %53 = arith.index_cast %52 : i32 to index
    %c0_29 = arith.constant 0 : index
    %54 = vector.load %arg8[%53, %c0_29] : memref<32x16xf32, #tpu.memory_space<vmem>>, vector<16x16xf32>
    %cst_30 = arith.constant 1.000000e+00 : f32
    %55 = arith.subf %cst_30, %12 : f32
    %56 = vector.broadcast %55 : f32 to vector<16x16xf32>
    %57 = arith.mulf %56, %51 : vector<16x16xf32>
    %58 = vector.broadcast %12 : f32 to vector<16x16xf32>
    %59 = arith.mulf %58, %54 : vector<16x16xf32>
    %60 = arith.addf %57, %59 : vector<16x16xf32>
    %61 = arith.truncf %60 : vector<16x16xf32> to vector<16x16xbf16>
    %cst_31 = arith.constant dense<0.000000e+00> : vector<16x16xf32>
    %62 = tpu.matmul %61, %26, %cst_31 {dimension_numbers = #tpu.dot_dimension_numbers<[1], [0], [0], [1], [0, 0, 1, 1], [], []>} : vector<16x16xbf16>, vector<16x16xbf16>, vector<16x16xf32> -> vector<16x16xf32>
    %c0_32 = arith.constant 0 : index
    %c1_33 = arith.constant 1 : index
    %c0_34 = arith.constant 0 : index
    %c0_35 = arith.constant 0 : index
    %63 = vector.load %arg7[%c0_32, %c1_33, %c0_34, %c0_35] : memref<1x4x16x16xf32, #tpu.memory_space<vmem>>, vector<1x1x16x16xf32>
    %64 = vector.shape_cast %63 : vector<1x1x16x16xf32> to vector<16x16xf32>
    %65 = vector.shape_cast %62 : vector<16x16xf32> to vector<1x1x16x16xf32>
    tpu.vector_store %arg7[%c0_32, %c1_33, %c0_34, %c0_35], %65 {strides = array<i32>} : memref<1x4x16x16xf32, #tpu.memory_space<vmem>>, vector<1x1x16x16xf32>,
    %c0_36 = arith.constant 0 : index
    %c2 = arith.constant 2 : index
    %c0_37 = arith.constant 0 : index
    %c0_38 = arith.constant 0 : index
    %66 = vector.load %arg5[%c0_36, %c2, %c0_37, %c0_38] : memref<1x4x16x16xf32, #tpu.memory_space<vmem>>, vector<1x1x16x16xf32>
    %67 = vector.shape_cast %66 : vector<1x1x16x16xf32> to vector<16x16xf32>
    %c8_39 = arith.constant 8 : index
    %c0_40 = arith.constant 0 : index
    %68 = vector.load %arg8[%c8_39, %c0_40] : memref<32x16xf32, #tpu.memory_space<vmem>>, vector<16x16xf32>
    tpu.vector_store %arg8[%c8_39, %c0_40], %67 {strides = array<i32>} : memref<32x16xf32, #tpu.memory_space<vmem>>, vector<16x16xf32>,
    %69 = arith.index_cast %27 : i32 to index
    %c0_41 = arith.constant 0 : index
    %70 = vector.load %arg8[%69, %c0_41] : memref<32x16xf32, #tpu.memory_space<vmem>>, vector<16x16xf32>
    %c1_i32_42 = arith.constant 1 : i32
    %71 = arith.addi %27, %c1_i32_42 : i32
    %72 = arith.index_cast %71 : i32 to index
    %c0_43 = arith.constant 0 : index
    %73 = vector.load %arg8[%72, %c0_43] : memref<32x16xf32, #tpu.memory_space<vmem>>, vector<16x16xf32>
    %cst_44 = arith.constant 1.000000e+00 : f32
    %74 = arith.subf %cst_44, %12 : f32
    %75 = vector.broadcast %74 : f32 to vector<16x16xf32>
    %76 = arith.mulf %75, %70 : vector<16x16xf32>
    %77 = vector.broadcast %12 : f32 to vector<16x16xf32>
    %78 = arith.mulf %77, %73 : vector<16x16xf32>
    %79 = arith.addf %76, %78 : vector<16x16xf32>
    %80 = arith.truncf %79 : vector<16x16xf32> to vector<16x16xbf16>
    %cst_45 = arith.constant dense<0.000000e+00> : vector<16x16xf32>
    %81 = tpu.matmul %80, %26, %cst_45 {dimension_numbers = #tpu.dot_dimension_numbers<[1], [0], [0], [1], [0, 0, 1, 1], [], []>} : vector<16x16xbf16>, vector<16x16xbf16>, vector<16x16xf32> -> vector<16x16xf32>
    %c0_46 = arith.constant 0 : index
    %c2_47 = arith.constant 2 : index
    %c0_48 = arith.constant 0 : index
    %c0_49 = arith.constant 0 : index
    %82 = vector.load %arg7[%c0_46, %c2_47, %c0_48, %c0_49] : memref<1x4x16x16xf32, #tpu.memory_space<vmem>>, vector<1x1x16x16xf32>
    %83 = vector.shape_cast %82 : vector<1x1x16x16xf32> to vector<16x16xf32>
    %84 = vector.shape_cast %81 : vector<16x16xf32> to vector<1x1x16x16xf32>
    tpu.vector_store %arg7[%c0_46, %c2_47, %c0_48, %c0_49], %84 {strides = array<i32>} : memref<1x4x16x16xf32, #tpu.memory_space<vmem>>, vector<1x1x16x16xf32>,
    %c0_50 = arith.constant 0 : index
    %c3 = arith.constant 3 : index
    %c0_51 = arith.constant 0 : index
    %c0_52 = arith.constant 0 : index
    %85 = vector.load %arg5[%c0_50, %c3, %c0_51, %c0_52] : memref<1x4x16x16xf32, #tpu.memory_space<vmem>>, vector<1x1x16x16xf32>
    %86 = vector.shape_cast %85 : vector<1x1x16x16xf32> to vector<16x16xf32>
    %c8_53 = arith.constant 8 : index
    %c0_54 = arith.constant 0 : index
    %87 = vector.load %arg8[%c8_53, %c0_54] : memref<32x16xf32, #tpu.memory_space<vmem>>, vector<16x16xf32>
    tpu.vector_store %arg8[%c8_53, %c0_54], %86 {strides = array<i32>} : memref<32x16xf32, #tpu.memory_space<vmem>>, vector<16x16xf32>,
    %88 = arith.index_cast %27 : i32 to index
    %c0_55 = arith.constant 0 : index
    %89 = vector.load %arg8[%88, %c0_55] : memref<32x16xf32, #tpu.memory_space<vmem>>, vector<16x16xf32>
    %c1_i32_56 = arith.constant 1 : i32
    %90 = arith.addi %27, %c1_i32_56 : i32
    %91 = arith.index_cast %90 : i32 to index
    %c0_57 = arith.constant 0 : index
    %92 = vector.load %arg8[%91, %c0_57] : memref<32x16xf32, #tpu.memory_space<vmem>>, vector<16x16xf32>
    %cst_58 = arith.constant 1.000000e+00 : f32
    %93 = arith.subf %cst_58, %12 : f32
    %94 = vector.broadcast %93 : f32 to vector<16x16xf32>
    %95 = arith.mulf %94, %89 : vector<16x16xf32>
    %96 = vector.broadcast %12 : f32 to vector<16x16xf32>
    %97 = arith.mulf %96, %92 : vector<16x16xf32>
    %98 = arith.addf %95, %97 : vector<16x16xf32>
    %99 = arith.truncf %98 : vector<16x16xf32> to vector<16x16xbf16>
    %cst_59 = arith.constant dense<0.000000e+00> : vector<16x16xf32>
    %100 = tpu.matmul %99, %26, %cst_59 {dimension_numbers = #tpu.dot_dimension_numbers<[1], [0], [0], [1], [0, 0, 1, 1], [], []>} : vector<16x16xbf16>, vector<16x16xbf16>, vector<16x16xf32> -> vector<16x16xf32>
    %c0_60 = arith.constant 0 : index
    %c3_61 = arith.constant 3 : index
    %c0_62 = arith.constant 0 : index
    %c0_63 = arith.constant 0 : index
    %101 = vector.load %arg7[%c0_60, %c3_61, %c0_62, %c0_63] : memref<1x4x16x16xf32, #tpu.memory_space<vmem>>, vector<1x1x16x16xf32>
    %102 = vector.shape_cast %101 : vector<1x1x16x16xf32> to vector<16x16xf32>
    %103 = vector.shape_cast %100 : vector<16x16xf32> to vector<1x1x16x16xf32>
    tpu.vector_store %arg7[%c0_60, %c3_61, %c0_62, %c0_63], %103 {strides = array<i32>} : memref<1x4x16x16xf32, #tpu.memory_space<vmem>>, vector<1x1x16x16xf32>,
    return
  }
  func.func @transform_0(%arg0: i32, %arg1: memref<2xi32, #tpu.memory_space<smem>>, %arg2: memref<2xi32, #tpu.memory_space<smem>>, %arg3: memref<2xf32, #tpu.memory_space<smem>>, %arg4: memref<2xf32, #tpu.memory_space<smem>>) -> (i32, i32, i32, i32) {
    %c0_i32 = arith.constant 0 : i32
    %c0_i32_0 = arith.constant 0 : i32
    %c0_i32_1 = arith.constant 0 : i32
    %c0_i32_2 = arith.constant 0 : i32
    return %arg0, %c0_i32, %c0_i32_0, %c0_i32_1 : i32, i32, i32, i32
  }
  func.func @transform_1(%arg0: i32, %arg1: memref<2xi32, #tpu.memory_space<smem>>, %arg2: memref<2xi32, #tpu.memory_space<smem>>, %arg3: memref<2xf32, #tpu.memory_space<smem>>, %arg4: memref<2xf32, #tpu.memory_space<smem>>) -> (i32, i32) {
    %c0_i32 = arith.constant 0 : i32
    %c0_i32_0 = arith.constant 0 : i32
    %c0_i32_1 = arith.constant 0 : i32
    return %c0_i32, %c0_i32_0 : i32, i32
  }
  func.func @transform_2(%arg0: i32, %arg1: memref<2xi32, #tpu.memory_space<smem>>, %arg2: memref<2xi32, #tpu.memory_space<smem>>, %arg3: memref<2xf32, #tpu.memory_space<smem>>, %arg4: memref<2xf32, #tpu.memory_space<smem>>) -> (i32, i32, i32, i32) {
    %c0_i32 = arith.constant 0 : i32
    %c0_i32_0 = arith.constant 0 : i32
    %c0_i32_1 = arith.constant 0 : i32
    %c0_i32_2 = arith.constant 0 : i32
    return %arg0, %c0_i32, %c0_i32_0, %c0_i32_1 : i32, i32, i32, i32
  }
}

</mosaic_0001>

<bundles_post_ra>
// kernel: tpu_custom_call.1
= control target key start
LH: loop header
LB: loop body
LE: loop exit
PB: predicated region body
PF: predicated region fallthrough
CT: control target
= control target key end

     0   :  { %s899_s21 = smov [#allocation4]   ;;  %s1233_s0 = inlined_call_operand.hbm [shape: s32[2], index: 0, kind: input, shape index: {}]   ;;  %s1234_s4 = inlined_call_operand.hbm [shape: f32[2,4,16,16], index: 4, kind: input, shape index: {}]   ;;  %s1235_s5 = inlined_call_operand.hbm [shape: s32[16,16], index: 5, kind: input, shape index: {}]   ;;  %s1236_s6 = inlined_call_operand.hbm [shape: f32[2,4,16,16], index: 6, kind: output, shape index: {}]   ;;  %s1237_s1 = inlined_call_operand.vmem [shape: s32[2], index: 1, kind: input, shape index: {}]   ;;  %s1238_s2 = inlined_call_operand.vmem [shape: f32[2], index: 2, kind: input, shape index: {}]   ;;  %s1239_s3 = inlined_call_operand.vmem [shape: f32[2], index: 3, kind: input, shape index: {}]  }
   0x1   :  { %12 = dma.hbm_to_smem %s1233_s0, 16, %s899_s21, [#allocation3] }
   0x2   :  { %s13_s26 = sshll.u32 %s1237_s1, 4  ;;  %s17_s29 = sshll.u32 %s1238_s2, 4  ;;  %s14_s26 = int_to_ptr.vmem [resolvable:$true] %s13_s26  ;;  %s18_s29 = int_to_ptr.vmem [resolvable:$true] %s17_s29 }
   0x3   :  { %s737_s30 = scalar_lea.vmem %s14_s26, 16  ;;  %p742_p1 = scmp.lt.s32.totalorder %s14_s26, %s14_s26 }
   0x4   :  { %p738_p0 = scmp.ne.s32.totalorder %s14_s26, %s737_s30  ;;  %p743_p2 = scmp.lt.s32.totalorder %s737_s30, %s737_s30 }
   0x6   :  { %p744_p3 = por %p743_p2, %p742_p1 }
   0x8   :  { %p745_p4 = pnand %p744_p3, %p738_p0 }
   0xa   :  { %748 = shalt.err (!%p745_p4)  }
   0xb   :  { %s900_s7 = smov [#allocation5]   ;;  %s21_s9 = sshll.u32 %s1239_s3, 4  ;;  %s22_s9 = int_to_ptr.vmem [resolvable:$true] %s21_s9 }
   0xc   :  { %16 = dma.vmem_to_smem %s14_s26, 16, %s900_s7, [#allocation3] }
   0xd   :  { %s749_s1 = scalar_lea.vmem %s18_s29, 16  ;;  %p754_p6 = scmp.lt.s32.totalorder %s18_s29, %s18_s29 }
   0xe   :  { %p750_p5 = scmp.ne.s32.totalorder %s18_s29, %s749_s1  ;;  %p755_p7 = scmp.lt.s32.totalorder %s749_s1, %s749_s1 }
  0x10   :  { %p756_p8 = por %p755_p7, %p754_p6 }
  0x12   :  { %p757_p9 = pnand %p756_p8, %p750_p5 }
  0x14   :  { %760 = shalt.err (!%p757_p9)  }
  0x15   :  { %s901_s2 = smov [#allocation6]   ;;  %s761_s10 = scalar_lea.vmem %s22_s9, 16 }
  0x16   :  { %20 = dma.vmem_to_smem %s18_s29, 16, %s901_s2, [#allocation3] }
  0x17   :  { %p762_p10 = scmp.ne.s32.totalorder %s22_s9, %s761_s10  ;;  %p766_p11 = scmp.lt.s32.totalorder %s22_s9, %s22_s9 }
  0x18   :  { %p767_p12 = scmp.lt.s32.totalorder %s761_s10, %s761_s10 }
  0x1a   :  { %p768_p13 = por %p767_p12, %p766_p11 }
  0x1c   :  { %p769_p0 = pnand %p768_p13, %p762_p10 }
  0x1e   :  { %772 = shalt.err (!%p769_p0)  }
  0x1f   :  { %s902_s11 = smov [#allocation7]  }
  0x20   :  { %24 = dma.vmem_to_smem %s22_s9, 16, %s902_s11, [#allocation3] }
  0x21   :  { %869 = dma.done.wait [#allocation3], 64 }
  0x22   :  { %870 = vsyncadd [#allocation3], 4294967232 }
  0x23   :  { %26 = sfence }
  0x24   :  { %27 = vsyncpa [#allocation9], 0 }
  0x25   :  { %29 = vsyncpa [#allocation9 + $0x1], 0 }
  0x26   :  { %30 = vsyncpa [#allocation12], 0 }
  0x27   :  { %31 = vsyncpa [#allocation10], 0 }
  0x28   :  { %33 = vsyncpa [#allocation10 + $0x1], 0  ;;  %s959_s3 = smov 0   ;;  %s961_s12 = smov 0  }
  0x29   :  { %s963_s13 = smov 0   ;;  %s965_s14 = smov 0  }
  0x2a LB: > { %s980_s15 = sadd.s32 4294967295, %s897_s14   ;;  %s580_s16 = sadd.s32 4294967294, %s897_s14   ;;  %s897_s14 = sphi %s965_s14, %s1263_s14   ;;  %s893_s13 = sphi %s963_s13, %s1262_s13   ;;  %s889_s12 = sphi %s961_s12, %s1261_s12   ;;  %s885_s3 = sphi %s959_s3, %s1260_s3  }
  0x2b   : > { %p59_p1 = scmp.ne.s32.totalorder %s889_s12, %s885_s3  ;;  %p1240_p2 = scmp.eq.s32.totalorder %s980_s15, 0 }
  0x2c   : > { %p110_p4 = scmp.eq.s32.totalorder %s580_s16, 1  ;;  %p581_p6 = scmp.ge.s32.totalorder %s897_s14, 1 }
  0x2d   : > { %p989_p5 = por %p1240_p2, %p59_p1  ;;  %p117_p8 = scmp.lt.s32.totalorder %s897_s14, 3 }
  0x2e   : > { %p994_p7 = por %p110_p4, %p59_p1  ;;  %s903_s20 = smov [#allocation11]  }
  0x2f   : > { %s1244_s17 = scalar_select %p989_p5, 1, 0 }
  0x30   : > { %s1245_s18 = scalar_select %p994_p7, 1, 0 }
  0x31   : > { %p999_p9 = pnand %p581_p6, %p117_p8  ;;  %s129_s21 = sshll.u32 %s903_s20, 4  ;;  %s130_s21 = int_to_ptr.vmem [resolvable:$true] %s129_s21 }
  0x32   : > { %s1013_s23 = sadd.s32 1, %s897_s14   ;;  %s46_s24 = sadd.s32 1, %s893_s13 }
  0x33   : > { %s1246_s19 = scalar_select %p999_p9, 1, 0 }
  0x34   : > { %p670_p10 = pneg %p999_p9  ;;  %s43_s25 = ssub.s32 %s897_s14, %s1013_s23 }
  0x35   : > { %s784_s26 = scalar_lea.vmem %s130_s21, 256  ;;  %p792_p6 = scmp.lt.s32.totalorder %s130_s21, %s130_s21 }
  0x36   : > { %p1008_p12 = pnand %p670_p10, %p1240_p2  ;;  %p785_p0 = scmp.ne.s32.totalorder %s130_s21, %s784_s26 }
  0x37   : > { %p793_p8 = scmp.lt.s32.totalorder %s784_s26, %s784_s26 }
  0x38   : > { %p775_p13 = pneg %p1008_p12 }
  0x39   : > { %p794_p11 = por %p793_p8, %p792_p6 }
  0x3a   : > { %p787_p1 = pnand %p785_p0, %p775_p13 }
  0x3c   : > { %p788_p4 = pneg %p787_p1 }
  0x3e   : > { %p795_p3 = pnand %p794_p11, %p788_p4 }
  0x40   : > { %798 = shalt.err (!%p795_p3)
}
  0x41   : > { %s904_s27 = smov 128   ;;  %s905_s28 = smov 8  }
  0x42   : > { %673 = dma.hbm_to_vmem [thread:$0]  (!%p1008_p12), %s1235_s5, 256, %s130_s21, [#allocation12], %s904_s27, %s904_s27, %s905_s28  }
  0x43   : > { %p44_p3 = scmp.eq.s32.totalorder %s43_s25, 0  ;;  %p53_p10 = scmp.ne.s32.totalorder %s893_s13, %s889_s12 }
  0x44   : > { %p54_p11 = scmp.eq.s32.totalorder %s897_s14, 0  ;;  %p683_p13 = scmp.lt.s32.totalorder %s897_s14, 2 }
  0x45   : > { %s1033_s7 = scalar_select %p44_p3, %s893_s13, %s46_s24  }
  0x46   : > { %p55_p0 = por %p54_p11, %p53_p10  ;;  %p1248_p1 = scmp.eq.s32.totalorder %s980_s15, 1 }
  0x47   : > { %s143_s8 = sand.u32 1, %s893_s13   ;;  %s628_s9 = sshll.u32 %s897_s14, 10 }
  0x48   : > { %p1037_p4 = por %p1248_p1, %p53_p10  ;;  %s584_s1 = sshll.u32 %s143_s8, 6 }
  0x49   : > { %s1046_s11 = scalar_lea.hbm %s1234_s4, %s628_s9  ;;  %s147_s16 = scalar_lea.vmem [#allocation8], %s584_s1 }
  0x4a   : > { %s1249_s0 = scalar_select %p1037_p4, 1, 0 }
  0x4b   : > { %s154_s20 = sshll.u32 %s147_s16, 4  ;;  %p1048_p12 = pnand %p683_p13, %p55_p0  ;;  %s1052_s20 = int_to_ptr.vmem [resolvable:$true] %s154_s20 }
  0x4c   : > { %s1054_s22 = scalar_lea.sflag [#allocation9], %s143_s8  ;;  %s799_s24 = scalar_lea.hbm %s1046_s11, 1024 }
  0x4d   : > { %p800_p6 = scmp.ne.s32.totalorder %s1046_s11, %s799_s24  ;;  %p801_p8 = pneg %p1048_p12 }
  0x4e   : > { %s804_s29 = scalar_lea.hbm %s1234_s4, 2048  ;;  %p805_p11 = scmp.lt.s32.totalorder %s1046_s11, %s1234_s4 }
  0x4f   : > { %p802_p3 = pnand %p801_p8, %p800_p6  ;;  %p806_p13 = scmp.lt.s32.totalorder %s804_s29, %s799_s24 }
  0x51   : > { %p803_p10 = pneg %p802_p3  ;;  %p807_p0 = por %p806_p13, %p805_p11 }
  0x53   : > { %p808_p1 = pnand %p807_p0, %p803_p10 }
  0x55   : > { %811 = shalt.err (!%p808_p1)
}
  0x56   : > { %s812_s8 = scalar_lea.vmem %s1052_s20, 1024  ;;  %s906_s1 = smov [#allocation8]  }
  0x57   : > { %p813_p2 = scmp.ne.s32.totalorder %s1052_s20, %s812_s8  ;;  %s817_s2 = sshll.u32 %s906_s1, 4  ;;  %s818_s2 = int_to_ptr.vmem [resolvable:$false] %s817_s2 }
  0x58   : > { %s819_s10 = scalar_lea.vmem %s818_s2, 2048  ;;  %p820_p3 = scmp.lt.s32.totalorder %s1052_s20, %s818_s2 }
  0x59   : > { %p815_p7 = pnand %p813_p2, %p801_p8  ;;  %p821_p4 = scmp.lt.s32.totalorder %s819_s10, %s812_s8 }
  0x5b   : > { %p816_p6 = pneg %p815_p7  ;;  %p822_p5 = por %p821_p4, %p820_p3 }
  0x5d   : > { %p823_p9 = pnand %p822_p5, %p816_p6 }
  0x5f   : > { %826 = shalt.err (!%p823_p9)
}
  0x60   : > { %677 = dma.hbm_to_vmem [thread:$0]  (!%p1048_p12), %s1046_s11, 1024, %s1052_s20, %s1054_s22, %s904_s27, %s904_s27, %s905_s28  }
  0x61   : > { %p1251_p2 = scmp.ne.s32.totalorder %s1246_s19, 0 }
  0x62   : > { %s1081_s16 = sand.u32 (!%p1251_p2), 1, %s889_s12   ;;  %p1252_p5 = scmp.ne.s32.totalorder (!%p1251_p2), %s1244_s17, 0 }
  0x63   : > { %166 = sbr.rel (%p1251_p2) target bundleno = 365 (0x16d), region = 28  ;;  %s588_s24 = sshll.u32 (!%p1251_p2), %s1081_s16, 6 }
  0x64   : > { %s169_s25 = scalar_lea.sflag (!%p1251_p2), [#allocation9], %s1081_s16  ;;  %s1087_s21 = scalar_lea.vmem (!%p1251_p2), [#allocation8], %s588_s24 }
  0x68   : > { %872 = dma.done.wait (%p1252_p5), %s169_s25, 1024  }
  0x69   : > { %874 = vsyncadd (%p1252_p5), %s169_s25, 4294966272  ;;  %p1253_p7 = scmp.eq.s32.totalorder %s980_s15, 0 }
  0x6b   : > { %876 = dma.done.wait (%p1253_p7), [#allocation12], 256   ;;  %p1254_p9 = pmov %p1253_p7 }
  0x6c   : > { %vm198_vm0 = vcmask 130048   ;;  %v907_v0 = vmov 0.0   ;;  %s204_s17 = sld [smem:[#allocation5 + %s980_s15]]  ;;  %vm908_vm1 = vmmov 0   ;;  %v201_v1 = vld [vmem:[#allocation11] sm:$0xff]  ;;  %v202_v2 = vld [vmem:[#allocation11 + $0x8] sm:$0xff] }
  0x6d   : > { %878 = vsyncadd (%p1254_p9), [#allocation12], 4294967040  ;;  %199 = vst.msk [vmem:[#allocation2] sm:$0xff] %vm198_vm0, %v907_v0  ;;  %638 = vmatprep.subr.bf16.mxu0 %v907_v0  ;;  %644 = vmatprep.subr.bf16.mxu1 %v907_v0  ;;  %s206_s19 = sld [smem:[#allocation7 + %s980_s15]]  ;;  %v223_v4 = vld [vmem:[%s1087_s21] sm:$0xff]  ;;  %v224_v8 = vld [vmem:[%s1087_s21 + $0x8] sm:$0xff] }
  0x6e   : > { %200 = vst.msk [vmem:[#allocation2 + $0x18] sm:$0xff] %vm198_vm0, %v907_v0  ;;  %640 = vmatprep.mubr.msk.bf16.mxu0 %vm908_vm1, %v907_v0  ;;  %646 = vmatprep.mubr.msk.bf16.mxu1 %vm908_vm1, %v907_v0  ;;  %s205_s27 = sld [smem:[#allocation6 + %s980_s15]]  ;;  %225 = vst.msk [vmem:[#allocation2 + $0x8] sm:$0xff] %vm198_vm0, %v223_v4  ;;  %v596_v17 = vld [vmem:[%s1087_s21 + $0x10] sm:$0xff]  ;;  %v597_v18 = vld [vmem:[%s1087_s21 + $0x18] sm:$0xff]  ;;  %s196_s29 = scalar_lea.vmem [#allocation13], %s588_s24 }
  0x6f   : > { %s1111_s28 = sld [smem:[#allocation4 + %s980_s15]]  ;;  %226 = vst.msk [vmem:[#allocation2 + $0x10] sm:$0xff] %vm198_vm0, %v224_v8  ;;  %v605_v30 = vld [vmem:[%s1087_s21 + $0x20] sm:$0xff]  ;;  %v606_v31 = vld [vmem:[%s1087_s21 + $0x28] sm:$0xff]  ;;  %v614_v43 = vld [vmem:[%s1087_s21 + $0x30] sm:$0xff]  ;;  %s493_s30 = sshll.u32 %s196_s29, 4  ;;  %s1183_s30 = int_to_ptr.vmem [resolvable:$true] %s493_s30 }
  0x70   : > { %v615_v44 = vld [vmem:[%s1087_s21 + $0x38] sm:$0xff]  ;;  %s629_s9 = sshll.u32 %s980_s15, 10  ;;  %s480_s10 = scalar_lea.sflag [#allocation10], %s1081_s16 }
  0x71   : > { %s1189_s2 = scalar_lea.hbm %s1236_s6, %s629_s9  ;;  %s827_s15 = scalar_lea.vmem %s1183_s30, 1024 }
  0x72   : > { %v207_v3 = vstv %s204_s17  ;;  %s211_s11 = sadd.s32 1, %s204_s17  ;;  %p828_p4 = scmp.ne.s32.totalorder %s1183_s30, %s827_s15 }
  0x73   : > { %vm1114_vm2 = vcmp.eq.s32.totalorder %v201_v1, %v207_v3  ;;  %vm209_vm3 = vcmp.eq.s32.totalorder %v202_v2, %v207_v3  ;;  %s210_s20 = ssub.f32 1.0, %s206_s19  ;;  %v212_v6 = vstv %s211_s11  ;;  %v215_v7 = vstv %s206_s19  ;;  %p1257_p12 = scmp.ne.s32.totalorder %s1249_s0, 0 }
  0x74   : > { %vm213_vm4 = vcmp.eq.s32.totalorder %v201_v1, %v212_v6  ;;  %vm214_vm5 = vcmp.eq.s32.totalorder %v202_v2, %v212_v6  ;;  %s234_s22 = ssub.f32 1.0, %s205_s27  ;;  %v1123_v16 = vstv %s205_s27  ;;  %s909_s24 = smov [#allocation13]  }
  0x75   : > { %v216_v9 = vsel %vm213_vm4, %v215_v7, 0.0  ;;  %v217_v10 = vsel %vm214_vm5, %v215_v7, 0.0  ;;  %v218_v11 = vstv %s210_s20  ;;  %s1130_s26 = scalar_lea.vmem [#allocation2], %s1111_s28  ;;  %p829_p8 = pnand %p828_p4, %p1257_p12 }
  0x76   : > { %v219_v12 = vsel %vm1114_vm2, %v218_v11, %v216_v9  ;;  %v220_v13 = vsel %vm209_vm3, %v218_v11, %v217_v10  ;;  %v235_v15 = vstv %s234_s22  ;;  %v591_v19 = vld [vmem:[%s1130_s26 + $0x8] sm:$0xff]  ;;  %v592_v20 = vld [vmem:[%s1130_s26 + $0x10] sm:$0xff]  ;;  %s831_s25 = sshll.u32 %s909_s24, 4  ;;  %s832_s25 = int_to_ptr.vmem [resolvable:$false] %s831_s25 }
  0x77   : > { %v221_v14 = vpack.c.bf16 %v220_v13, %v219_v12  ;;  %v593_v21 = vld [vmem:[%s1130_s26 + $0x9] sm:$0xff]  ;;  %v594_v22 = vld [vmem:[%s1130_s26 + $0x11] sm:$0xff]  ;;  %v236_v23 = vmul.f32 %v591_v19, %v235_v15  ;;  %v237_v24 = vmul.f32 %v592_v20, %v235_v15  ;;  %p830_p10 = pneg %p829_p8  ;;  %s833_s21 = scalar_lea.vmem %s832_s25, 2048 }
  0x78   : > { %v239_v25 = vmul.f32 %v593_v21, %v1123_v16  ;;  %v240_v26 = vmul.f32 %v594_v22, %v1123_v16  ;;  %293 = vst.msk [vmem:[#allocation2 + $0x8] sm:$0xff] %vm198_vm0, %v596_v17  ;;  %294 = vst.msk [vmem:[#allocation2 + $0x10] sm:$0xff] %vm198_vm0, %v597_v18  ;;  %p834_p11 = scmp.lt.s32.totalorder %s1183_s30, %s832_s25  ;;  %p835_p13 = scmp.lt.s32.totalorder %s833_s21, %s827_s15 }
  0x79   : > { %639 = vmatpush3.bf16.msra.mxu0 %v221_v14  ;;  %645 = vmatpush3.bf16.msra.mxu1 %v221_v14 }
  0x7a   : > { %650 = vmatprep.subr.bf16.mxu0 %v907_v0  ;;  %656 = vmatprep.subr.bf16.mxu1 %v907_v0  ;;  %v241_v27 = vadd.f32 %v239_v25, %v236_v23  ;;  %v242_v28 = vadd.f32 %v240_v26, %v237_v24  ;;  %p836_p0 = por %p835_p13, %p834_p11 }
  0x7c   : > { %v243_v29 = vpack.c.bf16 %v242_v28, %v241_v27  ;;  %p837_p1 = pnand %p836_p0, %p830_p10 }
  0x7e   : > { %641 = vmatmul.mubr.msk.bf16.vlgmr.msra.gmra.mxu0 %vm198_vm0, %v243_v29 }
  0x7f   : > { %v598_v32 = vld [vmem:[%s1130_s26 + $0x8] sm:$0xff]  ;;  %v599_v33 = vld [vmem:[%s1130_s26 + $0x10] sm:$0xff]  ;;  %651 = vmatpush3.bf16.msra.mxu0 %v221_v14  ;;  %652 = vmatprep.mubr.msk.bf16.mxu0 %vm908_vm1, %v907_v0 }
  0x80   : > { %v600_v34 = vld [vmem:[%s1130_s26 + $0x9] sm:$0xff]  ;;  %v601_v35 = vld [vmem:[%s1130_s26 + $0x11] sm:$0xff]  ;;  %v299_v36 = vmul.f32 %v598_v32, %v235_v15  ;;  %v300_v37 = vmul.f32 %v599_v33, %v235_v15 }
  0x81   : > { %v301_v38 = vmul.f32 %v600_v34, %v1123_v16  ;;  %v302_v39 = vmul.f32 %v601_v35, %v1123_v16  ;;  %356 = vst.msk [vmem:[#allocation2 + $0x8] sm:$0xff] %vm198_vm0, %v605_v30  ;;  %357 = vst.msk [vmem:[#allocation2 + $0x10] sm:$0xff] %vm198_vm0, %v606_v31 }
  0x83   : > { %v303_v40 = vadd.f32 %v301_v38, %v299_v36  ;;  %v304_v41 = vadd.f32 %v302_v39, %v300_v37 }
  0x85   : > { %v305_v42 = vpack.c.bf16 %v304_v41, %v303_v40 }
  0x87   : > { %647 = vmatmul.mubr.msk.bf16.vlgmr.msra.gmra.mxu1 %vm198_vm0, %v305_v42 }
  0x88   : > { %657 = vmatpush3.bf16.msra.mxu1 %v221_v14  ;;  %v607_v45 = vld [vmem:[%s1130_s26 + $0x8] sm:$0xff]  ;;  %v608_v46 = vld [vmem:[%s1130_s26 + $0x10] sm:$0xff]  ;;  %658 = vmatprep.mubr.msk.bf16.mxu1 %vm908_vm1, %v907_v0 }
  0x89   : > { %v609_v47 = vld [vmem:[%s1130_s26 + $0x9] sm:$0xff]  ;;  %v610_v48 = vld [vmem:[%s1130_s26 + $0x11] sm:$0xff]  ;;  %v362_v49 = vmul.f32 %v607_v45, %v235_v15  ;;  %v363_v50 = vmul.f32 %v608_v46, %v235_v15 }
  0x8a   : > { %v364_v51 = vmul.f32 %v609_v47, %v1123_v16  ;;  %v365_v52 = vmul.f32 %v610_v48, %v1123_v16  ;;  %419 = vst.msk [vmem:[#allocation2 + $0x8] sm:$0xff] %vm198_vm0, %v614_v43  ;;  %420 = vst.msk [vmem:[#allocation2 + $0x10] sm:$0xff] %vm198_vm0, %v615_v44 }
  0x8c   : > { %v366_v53 = vadd.f32 %v364_v51, %v362_v49  ;;  %v367_v54 = vadd.f32 %v365_v52, %v363_v50 }
  0x8e   : > { %v368_v55 = vpack.c.bf16 %v367_v54, %v366_v53 }
  0x90   : > { %653 = vmatmul.mubr.msk.bf16.vlgmr.msra.gmra.mxu0 %vm198_vm0, %v368_v55 }
  0x91   : > { %v616_v56 = vld [vmem:[%s1130_s26 + $0x8] sm:$0xff]  ;;  %v617_v57 = vld [vmem:[%s1130_s26 + $0x10] sm:$0xff] }
  0x92   : > { %v618_v58 = vld [vmem:[%s1130_s26 + $0x9] sm:$0xff]  ;;  %v619_v59 = vld [vmem:[%s1130_s26 + $0x11] sm:$0xff]  ;;  %v425_v60 = vmul.f32 %v616_v56, %v235_v15  ;;  %v426_v61 = vmul.f32 %v617_v57, %v235_v15 }
  0x93   : > { %v427_v62 = vmul.f32 %v618_v58, %v1123_v16  ;;  %v428_v63 = vmul.f32 %v619_v59, %v1123_v16 }
  0x95   : > { %v429_v0 = vadd.f32 %v427_v62, %v425_v60  ;;  %v430_v1 = vadd.f32 %v428_v63, %v426_v61 }
  0x97   : > { %v431_v2 = vpack.c.bf16 %v430_v1, %v429_v0 }
  0x99   : > { %659 = vmatmul.mubr.msk.bf16.vlgmr.msra.gmra.mxu1 %vm198_vm0, %v431_v2 }
 0x13e   : > { %v281_v3 = vpop.f32.mrf.mxu0 }
 0x13f   : > { %288 = vst.msk [vmem:[%s196_s29] sm:$0xff] %vm198_vm0, %v281_v3 }
 0x140   : > { %v642_v4 = vpop.f32.mrf.mxu0 }
 0x142   : > { %v284_v5 = vpop.f32.mrf.mxu0 }
 0x143   : > { %289 = vst.msk [vmem:[%s196_s29 + $0x8] sm:$0xff] %vm198_vm0, %v284_v5 }
 0x144   : > { %v643_v6 = vpop.f32.mrf.mxu0 }
 0x147   : > { %v343_v7 = vpop.f32.mrf.mxu1 }
 0x148   : > { %603 = vst.msk [vmem:[%s196_s29 + $0x10] sm:$0xff] %vm198_vm0, %v343_v7 }
 0x149   : > { %v648_v8 = vpop.f32.mrf.mxu1 }
 0x14b   : > { %v346_v9 = vpop.f32.mrf.mxu1 }
 0x14c   : > { %604 = vst.msk [vmem:[%s196_s29 + $0x18] sm:$0xff] %vm198_vm0, %v346_v9 }
 0x14d   : > { %v649_v10 = vpop.f32.mrf.mxu1 }
 0x150   : > { %v406_v11 = vpop.f32.mrf.mxu0 }
 0x151   : > { %612 = vst.msk [vmem:[%s196_s29 + $0x20] sm:$0xff] %vm198_vm0, %v406_v11 }
 0x152   : > { %v654_v12 = vpop.f32.mrf.mxu0 }
 0x154   : > { %v409_v13 = vpop.f32.mrf.mxu0 }
 0x155   : > { %613 = vst.msk [vmem:[%s196_s29 + $0x28] sm:$0xff] %vm198_vm0, %v409_v13 }
 0x156   : > { %v655_v14 = vpop.f32.mrf.mxu0 }
 0x159   : > { %v469_v15 = vpop.f32.mrf.mxu1 }
 0x15a   : > { %621 = vst.msk [vmem:[%s196_s29 + $0x30] sm:$0xff] %vm198_vm0, %v469_v15 }
 0x15b   : > { %v660_v16 = vpop.f32.mrf.mxu1 }
 0x15d   : > { %v472_v17 = vpop.f32.mrf.mxu1 }
 0x15e   : > { %622 = vst.msk [vmem:[%s196_s29 + $0x38] sm:$0xff] %vm198_vm0, %v472_v17 }
 0x15f   : > { %v661_v18 = vpop.f32.mrf.mxu1 }
 0x160   : > { %840 = shalt.err (!%p837_p1)
}
 0x161   : > { %s841_s17 = scalar_lea.hbm %s1189_s2, 1024  ;;  %s845_s28 = scalar_lea.hbm %s1236_s6, 2048 }
 0x162   : > { %p842_p6 = scmp.ne.s32.totalorder %s1189_s2, %s841_s17  ;;  %p846_p5 = scmp.lt.s32.totalorder %s1189_s2, %s1236_s6 }
 0x163   : > { %p847_p7 = scmp.lt.s32.totalorder %s845_s28, %s841_s17 }
 0x164   : > { %p843_p3 = pnand %p842_p6, %p1257_p12 }
 0x165   : > { %p848_p9 = por %p847_p7, %p846_p5 }
 0x166   : > { %p844_p2 = pneg %p843_p3 }
 0x168   : > { %p849_p4 = pnand %p848_p9, %p844_p2 }
 0x16a   : > { %852 = shalt.err (!%p849_p4)
}
 0x16b   : > { %s910_s22 = smov 128   ;;  %s911_s26 = smov 8  }
 0x16c   : > { %668 = dma.vmem_to_hbm [thread:$0]  (%p1257_p12), %s1183_s30, 1024, %s1189_s2, %s480_s10, %s910_s22, %s910_s22, %s911_s26  }
 0x16d PF: > { %s508_s29 = sand.u32 1, %s885_s3   ;;  %p1258_p8 = scmp.ne.s32.totalorder %s1245_s18, 0 }
 0x16e   : > { %p1259_p10 = scmp.ge.s32.totalorder %s897_s14, 2  ;;  %s509_s9 = scalar_lea.sflag [#allocation10], %s508_s29 }
 0x170   : > { %p679_p11 = pnand %p1259_p10, %p1258_p8 }
 0x172   : > { %p680_p13 = pneg %p679_p11 }
 0x174   : > { %880 = dma.done.wait (%p680_p13), %s509_s9, 1024  }
 0x175   : > { %882 = vsyncadd (%p680_p13), %s509_s9, 4294966272  ;;  %p36_p0 = scmp.ge.s32.totalorder %s1013_s23, 4   ;;  %s1260_s3 = smov %s889_s12 }
 0x176   : > { %s1261_s12 = smov %s893_s13  ;;  %s1262_s13 = smov %s1033_s7 }
 0x177   : > { %s1263_s14 = smov %s1013_s23  ;;  %38 = sbr.rel (!%p36_p0) target bundleno = 42 (0x2a), region = 85 }
 0x17c   :  { %514 = vsyncpa [#allocation9], 1 }
 0x17d   :  { %516 = vsyncpa [#allocation9 + $0x1], 1 }
 0x17e   :  { %517 = vsyncpa [#allocation12], 1 }
 0x17f   :  { %518 = vsyncpa [#allocation10], 1 }
 0x180   :  { %520 = vsyncpa [#allocation10 + $0x1], 1 }

</bundles_post_ra>
